<compile_context>
chip_gen: v7x
topology: tpu7x:2x2x1
jax: 0.10.0
libtpu: 0.0.40
codegen_flags: <defaults>
</compile_context>

<pallas_src>
import functools

import jax
import jax.numpy as jnp
from jax.experimental import pallas as pl
from jax.experimental.pallas import tpu as pltpu

BN_EPS = 1e-5
LEAKY_SLOPE = 0.1

_LANE = 128
_SUBLANE = 8
_VMEM_TILE_BUDGET = 24 * 1024 * 1024   # conservative double-buffered working set
_VMEM_LIMIT_BYTES = 48 * 1024 * 1024   # fits v5e / v6e / v7x with headroom


def _round_up(x, m):
    return (x + m - 1) // m * m


def _choose_tm(m, k_pad, o_pad):
    """Largest M tile that keeps the double-buffered working set under budget
    and (when possible) leaves >=2 grid steps for megacore sharding on v7x."""
    for tm in (512, 256, 128, 64, 32, 16, 8):
        working = 2 * (tm * k_pad * 2       # bf16 patch tile, double buffered
                       + tm * o_pad * 4     # f32 conv tile, double buffered
                       + k_pad * o_pad * 2)  # bf16 weight (counted x2, safe)
        if working <= _VMEM_TILE_BUDGET and (m >= 2 * tm or tm == 8):
            return tm
    return 8


def _conv_stats_kernel(p_ref, w_ref, conv_ref, sum_ref, ssq_ref):
    # Conv as MXU matmul: bf16 inputs, f32 accumulation.
    conv = jnp.dot(p_ref[...], w_ref[...], preferred_element_type=jnp.float32)
    conv_ref[...] = conv
    # Per-channel partial BN statistics for this M tile, computed while the
    # conv tile is still live (single traversal; reduction finished outside).
    o_pad = conv.shape[-1]
    s = jnp.sum(conv, axis=0, keepdims=True)            # (1, O_pad)
    sq = jnp.sum(conv * conv, axis=0, keepdims=True)    # (1, O_pad)
    sum_ref[0] = jnp.broadcast_to(s, (_SUBLANE, o_pad))
    ssq_ref[0] = jnp.broadcast_to(sq, (_SUBLANE, o_pad))


def _bn_leaky_kernel(conv_ref, scale_ref, shift_ref, out_ref):
    # Folded BN: y = conv*scale + shift, then LeakyReLU(0.1).
    y = conv_ref[...] * scale_ref[...] + shift_ref[...]
    out_ref[...] = jnp.where(y > 0, y, LEAKY_SLOPE * y).astype(out_ref.dtype)


def _im2col(x, kernel_size, stride, padding):
    """x: (N, C, H, W) -> patches (N*Hout*Wout, C*kh*kw), plus (Hout, Wout)."""
    n, c, h, w = x.shape
    kh = kw = kernel_size
    h_out = (h + 2 * padding - kh) // stride + 1
    w_out = (w + 2 * padding - kw) // stride + 1
    xp = jnp.pad(x, ((0, 0), (0, 0), (padding, padding), (padding, padding)))
    cols = []
    for i in range(kh):
        for j in range(kw):
            cols.append(xp[:, :, i:i + stride * h_out:stride,
                               j:j + stride * w_out:stride])   # (N, C, Hout, Wout)
    # (N, C, kh*kw, Hout, Wout) -> (N, Hout, Wout, C, kh*kw) -> (M, C*kh*kw)
    patches = jnp.stack(cols, axis=2)
    patches = patches.transpose(0, 3, 4, 1, 2).reshape(n * h_out * w_out, c * kh * kw)
    return patches, h_out, w_out


@functools.partial(jax.jit, static_argnames=("stride", "padding"))
def cnn_block(x, weight, gamma, beta, *, stride=1, padding=1):
    """x: (N, C, H, W) f32; weight: (O, C, kh, kw) f32 (PyTorch layout);
    gamma/beta: (O,) f32.  Returns (N, O, Hout, Wout) f32."""
    n, c, _, _ = x.shape
    o, c_w, kh, kw = weight.shape
    assert c == c_w and kh == kw

    # TODO(synk): for peak HBM efficiency the im2col expansion could be done
    # in-kernel via kh*kw shifted matmuls over an NHWC input; here it is fused
    # into the same jit so the 9x patch matrix is produced/consumed in one HLO.
    patches, h_out, w_out = _im2col(x, kh, stride, padding)        # (M, K) f32
    m, k = patches.shape

    k_pad = _round_up(k, _LANE)
    o_pad = _round_up(o, _LANE)
    tm = _choose_tm(m, k_pad, o_pad)
    m_pad = _round_up(m, tm)
    n_tiles = m_pad // tm

    # bf16 MXU inputs (f32 accumulation inside the kernel); zero-pad K/O/M.
    patches_p = jnp.zeros((m_pad, k_pad), jnp.bfloat16).at[:m, :k].set(
        patches.astype(jnp.bfloat16))
    w2d = weight.reshape(o, c * kh * kw).T.astype(jnp.bfloat16)    # (K, O)
    w_p = jnp.zeros((k_pad, o_pad), jnp.bfloat16).at[:k, :o].set(w2d)

    params = pltpu.CompilerParams(
        dimension_semantics=("parallel",),
        vmem_limit_bytes=_VMEM_LIMIT_BYTES)

    # ---- Pass 1: conv matmul + per-tile partial BN statistics ----
    conv_pad, sums, ssqs = pl.pallas_call(
        _conv_stats_kernel,
        out_shape=(
            jax.ShapeDtypeStruct((m_pad, o_pad), jnp.float32),
            jax.ShapeDtypeStruct((n_tiles, _SUBLANE, o_pad), jnp.float32),
            jax.ShapeDtypeStruct((n_tiles, _SUBLANE, o_pad), jnp.float32),
        ),
        grid_spec=pltpu.PrefetchScalarGridSpec(
            num_scalar_prefetch=0,
            grid=(n_tiles,),
            in_specs=[
                pl.BlockSpec((tm, k_pad), lambda i: (i, 0)),
                pl.BlockSpec((k_pad, o_pad), lambda i: (0, 0)),
            ],
            out_specs=(
                pl.BlockSpec((tm, o_pad), lambda i: (i, 0)),
                pl.BlockSpec((1, _SUBLANE, o_pad), lambda i: (i, 0, 0)),
                pl.BlockSpec((1, _SUBLANE, o_pad), lambda i: (i, 0, 0)),
            ),
        ),
        compiler_params=params,
    )(patches_p, w_p)

    # ---- Finish BN reduction (tiny) and fold gamma/beta into scale/shift ----
    total_sum = sums[:, 0, :].sum(axis=0)                 # (O_pad,)
    total_ssq = ssqs[:, 0, :].sum(axis=0)                 # (O_pad,)
    inv_m = 1.0 / m                                       # padded rows are zero
    mean = total_sum * inv_m
    var = jnp.maximum(total_ssq * inv_m - mean * mean, 0.0)   # biased (train mode)
    gamma_p = jnp.zeros((o_pad,), jnp.float32).at[:o].set(gamma.astype(jnp.float32))
    beta_p = jnp.zeros((o_pad,), jnp.float32).at[:o].set(beta.astype(jnp.float32))
    scale = gamma_p * jax.lax.rsqrt(var + BN_EPS)
    shift = beta_p - mean * scale
    scale2d = scale.reshape(1, o_pad)
    shift2d = shift.reshape(1, o_pad)

    # ---- Pass 2: normalize + LeakyReLU, M-tiled, lane-dense output ----
    out_pad = pl.pallas_call(
        _bn_leaky_kernel,
        out_shape=jax.ShapeDtypeStruct((m_pad, o_pad), x.dtype),
        grid_spec=pltpu.PrefetchScalarGridSpec(
            num_scalar_prefetch=0,
            grid=(n_tiles,),
            in_specs=[
                pl.BlockSpec((tm, o_pad), lambda i: (i, 0)),
                pl.BlockSpec((1, o_pad), lambda i: (0, 0)),
                pl.BlockSpec((1, o_pad), lambda i: (0, 0)),
            ],
            out_specs=pl.BlockSpec((tm, o_pad), lambda i: (i, 0)),
        ),
        compiler_params=params,
    )(conv_pad, scale2d, shift2d)

    out = out_pad[:m, :o].reshape(n, h_out, w_out, o)
    # NOTE: a full network would keep NHWC between blocks; convert back to
    # NCHW here only to match the PyTorch module's output layout exactly.
    return out.transpose(0, 3, 1, 2)


def _reference(x, weight, gamma, beta, *, stride=1, padding=1):
    conv = jax.lax.conv_general_dilated(
        x, weight, window_strides=(stride, stride),
        padding=[(padding, padding), (padding, padding)],
        dimension_numbers=("NCHW", "OIHW", "NCHW"))
    mean = jnp.mean(conv, axis=(0, 2, 3), keepdims=True)
    var = jnp.mean((conv - mean) ** 2, axis=(0, 2, 3), keepdims=True)
    xh = (conv - mean) * jax.lax.rsqrt(var + BN_EPS)
    y = xh * gamma.reshape(1, -1, 1, 1) + beta.reshape(1, -1, 1, 1)
    return jnp.where(y > 0, y, LEAKY_SLOPE * y)


if __name__ == "__main__":
    # Small deterministic example: CnnBlock(4, 8, kernel_size=3, stride=1, padding=1)
    N, C, H, W = 2, 4, 16, 16
    O, KS, STRIDE, PAD = 8, 3, 1, 1

    key = jax.random.PRNGKey(0)
    kx, kw_ = jax.random.split(key)
    x = jax.random.normal(kx, (N, C, H, W), dtype=jnp.float32)
    weight = jax.random.normal(kw_, (O, C, KS, KS), dtype=jnp.float32) * 0.1
    gamma = jnp.ones((O,), dtype=jnp.float32)   # BatchNorm2d default init
    beta = jnp.zeros((O,), dtype=jnp.float32)

    out = cnn_block(x, weight, gamma, beta, stride=STRIDE, padding=PAD)
    out = jax.block_until_ready(out)

    ref = _reference(x, weight, gamma, beta, stride=STRIDE, padding=PAD)
    assert out.shape == (N, O, H, W)
    # bf16 MXU inputs (f32 accumulation) vs f32 reference: BN-normalized
    # outputs are unit-scale, so a few e-2 absolute tolerance covers bf16
    # input quantization.
    assert jnp.allclose(out, ref, atol=5e-2, rtol=5e-2), "mismatch vs reference"
    print("KERNEL_OK")
</pallas_src>

<mosaic_0001>
module attributes {stable_mosaic.version = 11 : i64} {
  func.func @_conv_stats_kernel(%arg0: i32, %arg1: memref<256x128xbf16, #tpu.memory_space<vmem>>, %arg2: memref<128x128xbf16, #tpu.memory_space<vmem>>, %arg3: memref<256x128xf32, #tpu.memory_space<vmem>>, %arg4: memref<1x8x128xf32, #tpu.memory_space<vmem>>, %arg5: memref<1x8x128xf32, #tpu.memory_space<vmem>>) attributes {dimension_semantics = [#tpu.dimension_semantics<parallel>], iteration_bounds = array<i64: 2>, scalar_prefetch = 0 : i64, scratch_operands = 0 : i64, tpu.core_type = #tpu.core_type<tc>, window_params = [{transform_indices = @transform_0, window_bounds = array<i64: 256, 128>}, {pipeline_mode = #tpu.pipeline_mode<synchronous>, transform_indices = @transform_1, window_bounds = array<i64: 128, 128>}, {transform_indices = @transform_2, window_bounds = array<i64: 256, 128>}, {transform_indices = @transform_3, window_bounds = array<i64: 1, 8, 128>}, {transform_indices = @transform_4, window_bounds = array<i64: 1, 8, 128>}]} {
    %c0 = arith.constant 0 : index
    %c0_0 = arith.constant 0 : index
    %0 = vector.load %arg1[%c0, %c0_0] : memref<256x128xbf16, #tpu.memory_space<vmem>>, vector<256x128xbf16>
    %c0_1 = arith.constant 0 : index
    %c0_2 = arith.constant 0 : index
    %1 = vector.load %arg2[%c0_1, %c0_2] : memref<128x128xbf16, #tpu.memory_space<vmem>>, vector<128x128xbf16>
    %cst = arith.constant dense<0.000000e+00> : vector<256x128xf32>
    %2 = tpu.matmul %0, %1, %cst {dimension_numbers = #tpu.dot_dimension_numbers<[1], [0], [0], [1], [0, 0, 1, 1], [], []>} : vector<256x128xbf16>, vector<128x128xbf16>, vector<256x128xf32> -> vector<256x128xf32>
    %c0_3 = arith.constant 0 : index
    %c0_4 = arith.constant 0 : index
    %3 = vector.load %arg3[%c0_3, %c0_4] : memref<256x128xf32, #tpu.memory_space<vmem>>, vector<256x128xf32>
    tpu.vector_store %arg3[%c0_3, %c0_4], %2 {strides = array<i32>} : memref<256x128xf32, #tpu.memory_space<vmem>>, vector<256x128xf32>,
    %cst_5 = arith.constant dense<0.000000e+00> : vector<128xf32>
    %4 = vector.multi_reduction <add>, %2, %cst_5 [0] : vector<256x128xf32> to vector<128xf32>
    %5 = vector.shape_cast %4 : vector<128xf32> to vector<1x128xf32>
    %6 = arith.mulf %2, %2 : vector<256x128xf32>
    %cst_6 = arith.constant dense<0.000000e+00> : vector<128xf32>
    %7 = vector.multi_reduction <add>, %6, %cst_6 [0] : vector<256x128xf32> to vector<128xf32>
    %8 = vector.shape_cast %7 : vector<128xf32> to vector<1x128xf32>
    %9 = vector.shape_cast %5 : vector<1x128xf32> to vector<1x128xf32>
    %10 = vector.broadcast %9 : vector<1x128xf32> to vector<8x128xf32>
    %c0_7 = arith.constant 0 : index
    %c0_8 = arith.constant 0 : index
    %c0_9 = arith.constant 0 : index
    %11 = vector.load %arg4[%c0_7, %c0_8, %c0_9] : memref<1x8x128xf32, #tpu.memory_space<vmem>>, vector<1x8x128xf32>
    %12 = vector.shape_cast %11 : vector<1x8x128xf32> to vector<8x128xf32>
    %13 = vector.shape_cast %10 : vector<8x128xf32> to vector<1x8x128xf32>
    tpu.vector_store %arg4[%c0_7, %c0_8, %c0_9], %13 {strides = array<i32>} : memref<1x8x128xf32, #tpu.memory_space<vmem>>, vector<1x8x128xf32>,
    %14 = vector.shape_cast %8 : vector<1x128xf32> to vector<1x128xf32>
    %15 = vector.broadcast %14 : vector<1x128xf32> to vector<8x128xf32>
    %c0_10 = arith.constant 0 : index
    %c0_11 = arith.constant 0 : index
    %c0_12 = arith.constant 0 : index
    %16 = vector.load %arg5[%c0_10, %c0_11, %c0_12] : memref<1x8x128xf32, #tpu.memory_space<vmem>>, vector<1x8x128xf32>
    %17 = vector.shape_cast %16 : vector<1x8x128xf32> to vector<8x128xf32>
    %18 = vector.shape_cast %15 : vector<8x128xf32> to vector<1x8x128xf32>
    tpu.vector_store %arg5[%c0_10, %c0_11, %c0_12], %18 {strides = array<i32>} : memref<1x8x128xf32, #tpu.memory_space<vmem>>, vector<1x8x128xf32>,
    return
  }
  func.func @transform_0(%arg0: i32) -> (i32, i32) {
    %c0_i32 = arith.constant 0 : i32
    %c0_i32_0 = arith.constant 0 : i32
    return %arg0, %c0_i32 : i32, i32
  }
  func.func @transform_1(%arg0: i32) -> (i32, i32) {
    %c0_i32 = arith.constant 0 : i32
    %c0_i32_0 = arith.constant 0 : i32
    %c0_i32_1 = arith.constant 0 : i32
    return %c0_i32, %c0_i32_0 : i32, i32
  }
  func.func @transform_2(%arg0: i32) -> (i32, i32) {
    %c0_i32 = arith.constant 0 : i32
    %c0_i32_0 = arith.constant 0 : i32
    return %arg0, %c0_i32 : i32, i32
  }
  func.func @transform_3(%arg0: i32) -> (i32, i32, i32) {
    %c0_i32 = arith.constant 0 : i32
    %c0_i32_0 = arith.constant 0 : i32
    %c0_i32_1 = arith.constant 0 : i32
    return %arg0, %c0_i32, %c0_i32_0 : i32, i32, i32
  }
  func.func @transform_4(%arg0: i32) -> (i32, i32, i32) {
    %c0_i32 = arith.constant 0 : i32
    %c0_i32_0 = arith.constant 0 : i32
    %c0_i32_1 = arith.constant 0 : i32
    return %arg0, %c0_i32, %c0_i32_0 : i32, i32, i32
  }
}

module attributes {stable_mosaic.version = 11 : i64} {
  func.func @_bn_leaky_kernel(%arg0: i32, %arg1: memref<256x128xf32, #tpu.memory_space<vmem>>, %arg2: memref<1x128xf32, #tpu.memory_space<vmem>>, %arg3: memref<1x128xf32, #tpu.memory_space<vmem>>, %arg4: memref<256x128xf32, #tpu.memory_space<vmem>>) attributes {dimension_semantics = [#tpu.dimension_semantics<parallel>], iteration_bounds = array<i64: 2>, scalar_prefetch = 0 : i64, scratch_operands = 0 : i64, tpu.core_type = #tpu.core_type<tc>, window_params = [{transform_indices = @transform_0, window_bounds = array<i64: 256, 128>}, {pipeline_mode = #tpu.pipeline_mode<synchronous>, transform_indices = @transform_1, window_bounds = array<i64: 1, 128>}, {pipeline_mode = #tpu.pipeline_mode<synchronous>, transform_indices = @transform_2, window_bounds = array<i64: 1, 128>}, {transform_indices = @transform_3, window_bounds = array<i64: 256, 128>}]} {
    %c0 = arith.constant 0 : index
    %c0_0 = arith.constant 0 : index
    %0 = vector.load %arg1[%c0, %c0_0] : memref<256x128xf32, #tpu.memory_space<vmem>>, vector<256x128xf32>
    %c0_1 = arith.constant 0 : index
    %c0_2 = arith.constant 0 : index
    %1 = vector.load %arg2[%c0_1, %c0_2] : memref<1x128xf32, #tpu.memory_space<vmem>>, vector<1x128xf32>
    %2 = vector.broadcast %1 : vector<1x128xf32> to vector<256x128xf32>
    %3 = arith.mulf %0, %2 : vector<256x128xf32>
    %c0_3 = arith.constant 0 : index
    %c0_4 = arith.constant 0 : index
    %4 = vector.load %arg3[%c0_3, %c0_4] : memref<1x128xf32, #tpu.memory_space<vmem>>, vector<1x128xf32>
    %5 = vector.broadcast %4 : vector<1x128xf32> to vector<256x128xf32>
    %6 = arith.addf %3, %5 : vector<256x128xf32>
    %cst = arith.constant 0.000000e+00 : f32
    %7 = vector.broadcast %cst : f32 to vector<256x128xf32>
    %8 = arith.cmpf ogt, %6, %7 : vector<256x128xf32>
    %cst_5 = arith.constant 1.000000e-01 : f32
    %9 = vector.broadcast %cst_5 : f32 to vector<256x128xf32>
    %10 = arith.mulf %9, %6 : vector<256x128xf32>
    %11 = arith.select %8, %6, %10 : vector<256x128xi1>, vector<256x128xf32>
    %c0_6 = arith.constant 0 : index
    %c0_7 = arith.constant 0 : index
    %12 = vector.load %arg4[%c0_6, %c0_7] : memref<256x128xf32, #tpu.memory_space<vmem>>, vector<256x128xf32>
    tpu.vector_store %arg4[%c0_6, %c0_7], %11 {strides = array<i32>} : memref<256x128xf32, #tpu.memory_space<vmem>>, vector<256x128xf32>,
    return
  }
  func.func @transform_0(%arg0: i32) -> (i32, i32) {
    %c0_i32 = arith.constant 0 : i32
    %c0_i32_0 = arith.constant 0 : i32
    return %arg0, %c0_i32 : i32, i32
  }
  func.func @transform_1(%arg0: i32) -> (i32, i32) {
    %c0_i32 = arith.constant 0 : i32
    %c0_i32_0 = arith.constant 0 : i32
    %c0_i32_1 = arith.constant 0 : i32
    return %c0_i32, %c0_i32_0 : i32, i32
  }
  func.func @transform_2(%arg0: i32) -> (i32, i32) {
    %c0_i32 = arith.constant 0 : i32
    %c0_i32_0 = arith.constant 0 : i32
    %c0_i32_1 = arith.constant 0 : i32
    return %c0_i32, %c0_i32_0 : i32, i32
  }
  func.func @transform_3(%arg0: i32) -> (i32, i32) {
    %c0_i32 = arith.constant 0 : i32
    %c0_i32_0 = arith.constant 0 : i32
    return %arg0, %c0_i32 : i32, i32
  }
}

</mosaic_0001>

<bundles_post_ra>
// kernel: cnn_block.3
= control target key start
LH: loop header
LB: loop body
LE: loop exit
PB: predicated region body
PF: predicated region fallthrough
CT: control target
= control target key end

     0   :  { %s517_s12 = smov 0   ;;  %s679_s0 = inlined_call_operand.vmem [shape: f32[512,128], index: 0, kind: input, shape index: {}]   ;;  %s680_s1 = inlined_call_operand.vmem [shape: f32[1,128], index: 1, kind: input, shape index: {}]   ;;  %s681_s2 = inlined_call_operand.vmem [shape: f32[1,128], index: 2, kind: input, shape index: {}]   ;;  %s682_s3 = inlined_call_operand.vmem [shape: f32[512,128], index: 3, kind: output, shape index: {}]  }
   0x1 LB: > { %s468_s13 = sadd.s32 4294967295, %s495_s12   ;;  %p472_p0 = scmp.ge.s32.totalorder %s495_s12, 1  ;;  %s495_s12 = sphi %s517_s12, %s13_s12  }
   0x2   : > { %p138_p1 = scmp.lt.s32.totalorder %s495_s12, 3 }
   0x4   : > { %p139_p2 = pnand %p472_p0, %p138_p1 }
   0x5   : > { %s473_s14 = sshll.u32 (!%p139_p2), %s468_s13, 5  ;;  %v531_v0 = vld [vmem:[%s680_s1] ss:$0 sm:$0xff] (!%p139_p2) }
   0x6   : > { %142 = sbr.rel (%p139_p2) target bundleno = 62 (0x3e), region = 32  ;;  %p163_p3 = scmp.lt.s32.totalorder (!%p139_p2), %s473_s14, 63  ;;  %v541_v1 = vld [vmem:[%s681_s2] ss:$0 sm:$0xff] (!%p139_p2) }
   0xd   : > { %s684_s14 = smov (!%p163_p3, %s473_s14), 63 }
   0xe   : > { %s474_s15 = sshll.u32 %s684_s14, 3 }
   0xf   : > { %s536_s20 = scalar_lea.vmem %s679_s0, %s474_s15  ;;  %s569_s25 = scalar_lea.vmem %s682_s3, %s474_s15 }
  0x10   : > { %v174_v2 = vld [vmem:[%s536_s20] sm:$0xff]  ;;  %v175_v3 = vld [vmem:[%s536_s20 + $0x8] sm:$0xff]  ;;  %v176_v4 = vld [vmem:[%s536_s20 + $0x10] sm:$0xff] }
  0x11   : > { %v213_v5 = vmul.f32 %v531_v0, %v174_v2  ;;  %v214_v6 = vmul.f32 %v531_v0, %v175_v3  ;;  %v215_v7 = vmul.f32 %v531_v0, %v176_v4  ;;  %v177_v8 = vld [vmem:[%s536_s20 + $0x18] sm:$0xff]  ;;  %v178_v9 = vld [vmem:[%s536_s20 + $0x20] sm:$0xff]  ;;  %v179_v10 = vld [vmem:[%s536_s20 + $0x28] sm:$0xff] }
  0x12   : > { %v216_v11 = vmul.f32 %v531_v0, %v177_v8  ;;  %v217_v12 = vmul.f32 %v531_v0, %v178_v9  ;;  %v218_v13 = vmul.f32 %v531_v0, %v179_v10  ;;  %v180_v14 = vld [vmem:[%s536_s20 + $0x30] sm:$0xff]  ;;  %v181_v15 = vld [vmem:[%s536_s20 + $0x38] sm:$0xff]  ;;  %v182_v24 = vld [vmem:[%s536_s20 + $0x40] sm:$0xff] }
  0x13   : > { %v252_v16 = vadd.f32 %v541_v1, %v213_v5  ;;  %v253_v17 = vadd.f32 %v541_v1, %v214_v6  ;;  %v254_v18 = vadd.f32 %v541_v1, %v215_v7  ;;  %v219_v19 = vmul.f32 %v531_v0, %v180_v14  ;;  %v183_v32 = vld [vmem:[%s536_s20 + $0x48] sm:$0xff]  ;;  %v184_v33 = vld [vmem:[%s536_s20 + $0x50] sm:$0xff]  ;;  %v185_v34 = vld [vmem:[%s536_s20 + $0x58] sm:$0xff] }
  0x14   : > { %v255_v20 = vadd.f32 %v541_v1, %v216_v11  ;;  %v256_v21 = vadd.f32 %v541_v1, %v217_v12  ;;  %v257_v22 = vadd.f32 %v541_v1, %v218_v13  ;;  %v220_v23 = vmul.f32 %v531_v0, %v181_v15  ;;  %v186_v46 = vld [vmem:[%s536_s20 + $0x60] sm:$0xff]  ;;  %v187_v47 = vld [vmem:[%s536_s20 + $0x68] sm:$0xff]  ;;  %v188_v58 = vld [vmem:[%s536_s20 + $0x70] sm:$0xff] }
  0x15   : > { %vm284_vm0 = vcmp.gt.f32.partialorder %v252_v16, 0.0  ;;  %v316_v25 = vmul.f32 0.1, %v252_v16  ;;  %vm285_vm1 = vcmp.gt.f32.partialorder %v253_v17, 0.0  ;;  %v317_v26 = vmul.f32 0.1, %v253_v17 }
  0x16   : > { %vm286_vm2 = vcmp.gt.f32.partialorder %v254_v18, 0.0  ;;  %v318_v27 = vmul.f32 0.1, %v254_v18  ;;  %vm287_vm3 = vcmp.gt.f32.partialorder %v255_v20, 0.0  ;;  %v319_v28 = vmul.f32 0.1, %v255_v20 }
  0x17   : > { %v348_v29 = vsel %vm284_vm0, %v252_v16, %v316_v25  ;;  %v349_v30 = vsel %vm285_vm1, %v253_v17, %v317_v26  ;;  %vm288_vm4 = vcmp.gt.f32.partialorder %v256_v21, 0.0  ;;  %v320_v31 = vmul.f32 0.1, %v256_v21  ;;  %v189_v59 = vld [vmem:[%s536_s20 + $0x78] sm:$0xff]  ;;  %v190_v6 = vld [vmem:[%s536_s20 + $0x80] sm:$0xff]  ;;  %v191_v7 = vld [vmem:[%s536_s20 + $0x88] sm:$0xff] }
  0x18   : > { %380 = vst [vmem:[%s569_s25] sm:$0xff] %v348_v29  ;;  %381 = vst [vmem:[%s569_s25 + $0x8] sm:$0xff] %v349_v30  ;;  %v350_v35 = vsel %vm286_vm2, %v254_v18, %v318_v27  ;;  %v351_v36 = vsel %vm287_vm3, %v255_v20, %v319_v28  ;;  %vm289_vm5 = vcmp.gt.f32.partialorder %v257_v22, 0.0  ;;  %v321_v37 = vmul.f32 0.1, %v257_v22  ;;  %v192_v12 = vld [vmem:[%s536_s20 + $0x90] sm:$0xff]  ;;  %v193_v13 = vld [vmem:[%s536_s20 + $0x98] sm:$0xff] }
  0x19   : > { %382 = vst [vmem:[%s569_s25 + $0x10] sm:$0xff] %v350_v35  ;;  %383 = vst [vmem:[%s569_s25 + $0x18] sm:$0xff] %v351_v36  ;;  %v352_v38 = vsel %vm288_vm4, %v256_v21, %v320_v31  ;;  %v258_v39 = vadd.f32 %v541_v1, %v219_v19  ;;  %v259_v40 = vadd.f32 %v541_v1, %v220_v23  ;;  %v195_v25 = vld [vmem:[%s536_s20 + $0xa8] sm:$0xff]  ;;  %v196_v36 = vld [vmem:[%s536_s20 + $0xb0] sm:$0xff] }
  0x1a   : > { %v221_v41 = vmul.f32 %v531_v0, %v182_v24  ;;  %384 = vst [vmem:[%s569_s25 + $0x20] sm:$0xff] %v352_v38  ;;  %v353_v42 = vsel %vm289_vm5, %v257_v22, %v321_v37  ;;  %v222_v43 = vmul.f32 %v531_v0, %v183_v32  ;;  %v223_v44 = vmul.f32 %v531_v0, %v184_v33  ;;  %v194_v24 = vld [vmem:[%s536_s20 + $0xa0] sm:$0xff]  ;;  %v197_v37 = vld [vmem:[%s536_s20 + $0xb8] sm:$0xff] }
  0x1b   : > { %v224_v45 = vmul.f32 %v531_v0, %v185_v34  ;;  %385 = vst [vmem:[%s569_s25 + $0x28] sm:$0xff] %v353_v42  ;;  %vm290_vm6 = vcmp.gt.f32.partialorder %v258_v39, 0.0  ;;  %v322_v48 = vmul.f32 0.1, %v258_v39  ;;  %vm291_vm7 = vcmp.gt.f32.partialorder %v259_v40, 0.0 }
  0x1c   : > { %v323_v49 = vmul.f32 0.1, %v259_v40  ;;  %v260_v50 = vadd.f32 %v541_v1, %v221_v41  ;;  %v261_v51 = vadd.f32 %v541_v1, %v222_v43  ;;  %v262_v52 = vadd.f32 %v541_v1, %v223_v44 }
  0x1d   : > { %v263_v53 = vadd.f32 %v541_v1, %v224_v45  ;;  %v354_v54 = vsel %vm290_vm6, %v258_v39, %v322_v48  ;;  %v225_v56 = vmul.f32 %v531_v0, %v186_v46  ;;  %v226_v57 = vmul.f32 %v531_v0, %v187_v47  ;;  %v198_v46 = vld [vmem:[%s536_s20 + $0xc0] sm:$0xff]  ;;  %v199_v47 = vld [vmem:[%s536_s20 + $0xc8] sm:$0xff] }
  0x1e   : > { %v355_v55 = vsel %vm291_vm7, %v259_v40, %v323_v49  ;;  %386 = vst [vmem:[%s569_s25 + $0x30] sm:$0xff] %v354_v54  ;;  %vm292_vm8 = vcmp.gt.f32.partialorder %v260_v50, 0.0  ;;  %v324_v60 = vmul.f32 0.1, %v260_v50  ;;  %vm293_vm9 = vcmp.gt.f32.partialorder %v261_v51, 0.0 }
  0x1f   : > { %387 = vst [vmem:[%s569_s25 + $0x38] sm:$0xff] %v355_v55  ;;  %v325_v61 = vmul.f32 0.1, %v261_v51  ;;  %vm294_vm10 = vcmp.gt.f32.partialorder %v262_v52, 0.0  ;;  %v326_v62 = vmul.f32 0.1, %v262_v52  ;;  %v264_v4 = vadd.f32 %v541_v1, %v225_v56 }
  0x20   : > { %vm295_vm11 = vcmp.gt.f32.partialorder %v263_v53, 0.0  ;;  %v327_v63 = vmul.f32 0.1, %v263_v53  ;;  %v356_v2 = vsel %vm292_vm8, %v260_v50, %v324_v60  ;;  %v265_v5 = vadd.f32 %v541_v1, %v226_v57 }
  0x21   : > { %v357_v3 = vsel %vm293_vm9, %v261_v51, %v325_v61  ;;  %388 = vst [vmem:[%s569_s25 + $0x40] sm:$0xff] %v356_v2  ;;  %v358_v8 = vsel %vm294_vm10, %v262_v52, %v326_v62  ;;  %v227_v10 = vmul.f32 %v531_v0, %v188_v58  ;;  %v228_v11 = vmul.f32 %v531_v0, %v189_v59  ;;  %v200_v52 = vld [vmem:[%s536_s20 + $0xd0] sm:$0xff]  ;;  %v202_v2 = vld [vmem:[%s536_s20 + $0xe0] sm:$0xff] }
  0x22   : > { %389 = vst [vmem:[%s569_s25 + $0x48] sm:$0xff] %v357_v3  ;;  %v359_v9 = vsel %vm295_vm11, %v263_v53, %v327_v63  ;;  %390 = vst [vmem:[%s569_s25 + $0x50] sm:$0xff] %v358_v8  ;;  %vm296_vm12 = vcmp.gt.f32.partialorder %v264_v4, 0.0  ;;  %v328_v14 = vmul.f32 0.1, %v264_v4  ;;  %vm297_vm13 = vcmp.gt.f32.partialorder %v265_v5, 0.0 }
  0x23   : > { %391 = vst [vmem:[%s569_s25 + $0x58] sm:$0xff] %v359_v9  ;;  %v329_v15 = vmul.f32 0.1, %v265_v5  ;;  %v266_v16 = vadd.f32 %v541_v1, %v227_v10  ;;  %v267_v17 = vadd.f32 %v541_v1, %v228_v11  ;;  %v229_v18 = vmul.f32 %v531_v0, %v190_v6  ;;  %v201_v53 = vld [vmem:[%s536_s20 + $0xd8] sm:$0xff]  ;;  %v203_v3 = vld [vmem:[%s536_s20 + $0xe8] sm:$0xff] }
  0x24   : > { %v230_v19 = vmul.f32 %v531_v0, %v191_v7  ;;  %v360_v20 = vsel %vm296_vm12, %v264_v4, %v328_v14  ;;  %v231_v22 = vmul.f32 %v531_v0, %v192_v12  ;;  %v232_v23 = vmul.f32 %v531_v0, %v193_v13  ;;  %v204_v14 = vld [vmem:[%s536_s20 + $0xf0] sm:$0xff] }
  0x25   : > { %v361_v21 = vsel %vm297_vm13, %v265_v5, %v329_v15  ;;  %392 = vst [vmem:[%s569_s25 + $0x60] sm:$0xff] %v360_v20  ;;  %vm298_vm14 = vcmp.gt.f32.partialorder %v266_v16, 0.0  ;;  %v330_v26 = vmul.f32 0.1, %v266_v16  ;;  %vm299_vm15 = vcmp.gt.f32.partialorder %v267_v17, 0.0  ;;  %v205_v15 = vld [vmem:[%s536_s20 + $0xf8] sm:$0xff] }
  0x26   : > { %393 = vst [vmem:[%s569_s25 + $0x68] sm:$0xff] %v361_v21  ;;  %v331_v27 = vmul.f32 0.1, %v267_v17  ;;  %v268_v28 = vadd.f32 %v541_v1, %v229_v18  ;;  %v269_v29 = vadd.f32 %v541_v1, %v230_v19  ;;  %v270_v30 = vadd.f32 %v541_v1, %v231_v22 }
  0x27   : > { %v271_v31 = vadd.f32 %v541_v1, %v232_v23  ;;  %v362_v32 = vsel %vm298_vm14, %v266_v16, %v330_v26  ;;  %v233_v34 = vmul.f32 %v531_v0, %v194_v24  ;;  %v234_v35 = vmul.f32 %v531_v0, %v195_v25 }
  0x28   : > { %v363_v33 = vsel %vm299_vm15, %v267_v17, %v331_v27  ;;  %394 = vst [vmem:[%s569_s25 + $0x70] sm:$0xff] %v362_v32  ;;  %vm300_vm0 = vcmp.gt.f32.partialorder %v268_v28, 0.0  ;;  %v332_v38 = vmul.f32 0.1, %v268_v28  ;;  %vm301_vm1 = vcmp.gt.f32.partialorder %v269_v29, 0.0 }
  0x29   : > { %395 = vst [vmem:[%s569_s25 + $0x78] sm:$0xff] %v363_v33  ;;  %v333_v39 = vmul.f32 0.1, %v269_v29  ;;  %vm302_vm2 = vcmp.gt.f32.partialorder %v270_v30, 0.0  ;;  %v334_v40 = vmul.f32 0.1, %v270_v30  ;;  %v272_v44 = vadd.f32 %v541_v1, %v233_v34 }
  0x2a   : > { %vm303_vm3 = vcmp.gt.f32.partialorder %v271_v31, 0.0  ;;  %v335_v41 = vmul.f32 0.1, %v271_v31  ;;  %v364_v42 = vsel %vm300_vm0, %v268_v28, %v332_v38  ;;  %v273_v45 = vadd.f32 %v541_v1, %v234_v35 }
  0x2b   : > { %v365_v43 = vsel %vm301_vm1, %v269_v29, %v333_v39  ;;  %396 = vst [vmem:[%s569_s25 + $0x80] sm:$0xff] %v364_v42  ;;  %v366_v48 = vsel %vm302_vm2, %v270_v30, %v334_v40  ;;  %v235_v50 = vmul.f32 %v531_v0, %v196_v36  ;;  %v236_v51 = vmul.f32 %v531_v0, %v197_v37 }
  0x2c   : > { %397 = vst [vmem:[%s569_s25 + $0x88] sm:$0xff] %v365_v43  ;;  %v367_v49 = vsel %vm303_vm3, %v271_v31, %v335_v41  ;;  %398 = vst [vmem:[%s569_s25 + $0x90] sm:$0xff] %v366_v48  ;;  %vm304_vm4 = vcmp.gt.f32.partialorder %v272_v44, 0.0  ;;  %v336_v54 = vmul.f32 0.1, %v272_v44  ;;  %vm305_vm5 = vcmp.gt.f32.partialorder %v273_v45, 0.0 }
  0x2d   : > { %399 = vst [vmem:[%s569_s25 + $0x98] sm:$0xff] %v367_v49  ;;  %v337_v55 = vmul.f32 0.1, %v273_v45  ;;  %v274_v56 = vadd.f32 %v541_v1, %v235_v50  ;;  %v275_v57 = vadd.f32 %v541_v1, %v236_v51  ;;  %v237_v58 = vmul.f32 %v531_v0, %v198_v46 }
  0x2e   : > { %v238_v59 = vmul.f32 %v531_v0, %v199_v47  ;;  %v368_v60 = vsel %vm304_vm4, %v272_v44, %v336_v54  ;;  %v239_v62 = vmul.f32 %v531_v0, %v200_v52  ;;  %v240_v63 = vmul.f32 %v531_v0, %v201_v53 }
  0x2f   : > { %v369_v61 = vsel %vm305_vm5, %v273_v45, %v337_v55  ;;  %400 = vst [vmem:[%s569_s25 + $0xa0] sm:$0xff] %v368_v60  ;;  %vm306_vm6 = vcmp.gt.f32.partialorder %v274_v56, 0.0  ;;  %v338_v4 = vmul.f32 0.1, %v274_v56  ;;  %vm307_vm7 = vcmp.gt.f32.partialorder %v275_v57, 0.0 }
  0x30   : > { %401 = vst [vmem:[%s569_s25 + $0xa8] sm:$0xff] %v369_v61  ;;  %v339_v5 = vmul.f32 0.1, %v275_v57  ;;  %v276_v6 = vadd.f32 %v541_v1, %v237_v58  ;;  %v277_v7 = vadd.f32 %v541_v1, %v238_v59  ;;  %v278_v8 = vadd.f32 %v541_v1, %v239_v62 }
  0x31   : > { %v279_v9 = vadd.f32 %v541_v1, %v240_v63  ;;  %v370_v10 = vsel %vm306_vm6, %v274_v56, %v338_v4  ;;  %v241_v12 = vmul.f32 %v531_v0, %v202_v2  ;;  %v242_v13 = vmul.f32 %v531_v0, %v203_v3 }
  0x32   : > { %v371_v11 = vsel %vm307_vm7, %v275_v57, %v339_v5  ;;  %402 = vst [vmem:[%s569_s25 + $0xb0] sm:$0xff] %v370_v10  ;;  %vm308_vm8 = vcmp.gt.f32.partialorder %v276_v6, 0.0  ;;  %v340_v16 = vmul.f32 0.1, %v276_v6  ;;  %vm309_vm9 = vcmp.gt.f32.partialorder %v277_v7, 0.0 }
  0x33   : > { %403 = vst [vmem:[%s569_s25 + $0xb8] sm:$0xff] %v371_v11  ;;  %v341_v17 = vmul.f32 0.1, %v277_v7  ;;  %vm310_vm10 = vcmp.gt.f32.partialorder %v278_v8, 0.0  ;;  %v342_v18 = vmul.f32 0.1, %v278_v8  ;;  %v280_v22 = vadd.f32 %v541_v1, %v241_v12 }
  0x34   : > { %vm311_vm11 = vcmp.gt.f32.partialorder %v279_v9, 0.0  ;;  %v343_v19 = vmul.f32 0.1, %v279_v9  ;;  %v372_v20 = vsel %vm308_vm8, %v276_v6, %v340_v16  ;;  %v281_v23 = vadd.f32 %v541_v1, %v242_v13 }
  0x35   : > { %v373_v21 = vsel %vm309_vm9, %v277_v7, %v341_v17  ;;  %404 = vst [vmem:[%s569_s25 + $0xc0] sm:$0xff] %v372_v20  ;;  %v374_v24 = vsel %vm310_vm10, %v278_v8, %v342_v18  ;;  %v243_v26 = vmul.f32 %v531_v0, %v204_v14  ;;  %v244_v27 = vmul.f32 %v531_v0, %v205_v15 }
  0x36   : > { %405 = vst [vmem:[%s569_s25 + $0xc8] sm:$0xff] %v373_v21  ;;  %v375_v25 = vsel %vm311_vm11, %v279_v9, %v343_v19  ;;  %406 = vst [vmem:[%s569_s25 + $0xd0] sm:$0xff] %v374_v24  ;;  %vm312_vm12 = vcmp.gt.f32.partialorder %v280_v22, 0.0  ;;  %v344_v28 = vmul.f32 0.1, %v280_v22  ;;  %vm313_vm13 = vcmp.gt.f32.partialorder %v281_v23, 0.0 }
  0x37   : > { %407 = vst [vmem:[%s569_s25 + $0xd8] sm:$0xff] %v375_v25  ;;  %v345_v29 = vmul.f32 0.1, %v281_v23  ;;  %v282_v30 = vadd.f32 %v541_v1, %v243_v26  ;;  %v283_v31 = vadd.f32 %v541_v1, %v244_v27 }
  0x38   : > { %v376_v32 = vsel %vm312_vm12, %v280_v22, %v344_v28 }
  0x39   : > { %v377_v33 = vsel %vm313_vm13, %v281_v23, %v345_v29  ;;  %408 = vst [vmem:[%s569_s25 + $0xe0] sm:$0xff] %v376_v32  ;;  %vm314_vm14 = vcmp.gt.f32.partialorder %v282_v30, 0.0  ;;  %v346_v34 = vmul.f32 0.1, %v282_v30  ;;  %vm315_vm15 = vcmp.gt.f32.partialorder %v283_v31, 0.0 }
  0x3a   : > { %409 = vst [vmem:[%s569_s25 + $0xe8] sm:$0xff] %v377_v33  ;;  %v347_v0 = vmul.f32 0.1, %v283_v31 }
  0x3b   : > { %v378_v35 = vsel %vm314_vm14, %v282_v30, %v346_v34 }
  0x3c   : > { %v379_v36 = vsel %vm315_vm15, %v283_v31, %v347_v0  ;;  %410 = vst [vmem:[%s569_s25 + $0xf0] sm:$0xff] %v378_v35 }
  0x3d   : > { %411 = vst [vmem:[%s569_s25 + $0xf8] sm:$0xff] %v379_v36 }
  0x3e PF: > { %s13_s12 = sadd.s32 1, %s495_s12  }
  0x3f   : > { %p10_p4 = scmp.ge.s32.totalorder %s13_s12, 4  }
  0x41   :  { %12 = sbr.rel (!%p10_p4) target bundleno = 1 (0x1), region = 62 }

// kernel: cnn_block.2
= control target key start
LH: loop header
LB: loop body
LE: loop exit
PB: predicated region body
PF: predicated region fallthrough
CT: control target
= control target key end

     0   :  { %s1024_s15 = smov 0   ;;  %s1216_s0 = inlined_call_operand.vmem [shape: bf16[512,128], index: 0, kind: input, shape index: {}]   ;;  %s1217_s1 = inlined_call_operand.vmem [shape: bf16[128,128], index: 1, kind: input, shape index: {}]   ;;  %s1218_s2 = inlined_call_operand.vmem [shape: f32[512,128], index: 2, kind: output, shape index: {0}]   ;;  %s1219_s3 = inlined_call_operand.vmem [shape: f32[2,8,128], index: 3, kind: output, shape index: {1}]   ;;  %s1220_s4 = inlined_call_operand.vmem [shape: f32[2,8,128], index: 4, kind: output, shape index: {2}]  }
   0x1 LB: > { %s1030_s16 = sadd.s32 4294967295, %s997_s15   ;;  %p838_p0 = scmp.ge.s32.totalorder %s997_s15, 1  ;;  %s997_s15 = sphi %s1024_s15, %s15_s15  }
   0x2   : > { %p168_p1 = scmp.lt.s32.totalorder %s997_s15, 3 }
   0x4   : > { %p169_p2 = pnand %p838_p0, %p168_p1 }
   0x5   : > { %v967_v0 = vld [vmem:[%s1217_s1] sm:$0xff] (!%p169_p2)   ;;  %s839_s19 = sshll.u32 (!%p169_p2), %s1030_s16, 5  ;;  %v968_v1 = vld [vmem:[%s1217_s1 + $0x8] sm:$0xff] (!%p169_p2)   ;;  %v969_v2 = vld [vmem:[%s1217_s1 + $0x10] sm:$0xff] (!%p169_p2)   ;;  %p214_p4 = scmp.lt.s32.totalorder (!%p169_p2), %s1030_s16, 1 }
   0x6   : > { %172 = sbr.rel (%p169_p2) target bundleno = 330 (0x14a), region = 28  ;;  %p203_p3 = scmp.lt.s32.totalorder (!%p169_p2), %s839_s19, 63  ;;  %895 = vmatprep.subr.bf16.mxu0 (!%p169_p2), %v967_v0  ;;  %943 = vmatprep.subr.bf16.mxu1 (!%p169_p2), %v967_v0  ;;  %v970_v3 = vld [vmem:[%s1217_s1 + $0x18] sm:$0xff] (!%p169_p2)   ;;  %v971_v5 = vld [vmem:[%s1217_s1 + $0x20] sm:$0xff] (!%p169_p2)   ;;  %v972_v6 = vld [vmem:[%s1217_s1 + $0x28] sm:$0xff] (!%p169_p2)  }
   0x7   : > { %896 = vmatpush3.bf16.msra.mxu0 (!%p169_p2), %v967_v0  ;;  %951 = vmatpush3.bf16.msra.mxu1 (!%p169_p2), %v967_v0  ;;  %v973_v8 = vld [vmem:[%s1217_s1 + $0x30] sm:$0xff] (!%p169_p2)   ;;  %v974_v9 = vld [vmem:[%s1217_s1 + $0x38] sm:$0xff] (!%p169_p2)  }
   0x8   : > { %897 = vmatprep.subr.bf16.mxu0 (!%p169_p2), %v968_v1  ;;  %944 = vmatprep.subr.bf16.mxu1 (!%p169_p2), %v968_v1 }
   0xb   : > { %898 = vmatpush3.bf16.msra.mxu0 (!%p169_p2), %v968_v1  ;;  %952 = vmatpush3.bf16.msra.mxu1 (!%p169_p2), %v968_v1 }
   0xc   : > { %899 = vmatprep.subr.bf16.mxu0 (!%p169_p2), %v969_v2  ;;  %945 = vmatprep.subr.bf16.mxu1 (!%p169_p2), %v969_v2 }
   0xd   : > { %s1222_s19 = smov (!%p203_p3, %s839_s19), 63  ;;  %s1224_s16 = smov (!%p214_p4, %s1030_s16), 1 }
   0xe   : > { %s840_s24 = sshll.u32 %s1222_s19, 2  ;;  %s842_s12 = sshll.u32 %s1222_s19, 3 }
   0xf   : > { %s1050_s27 = scalar_lea.vmem %s1216_s0, %s840_s24  ;;  %900 = vmatpush3.bf16.msra.mxu0 %v969_v2  ;;  %953 = vmatpush3.bf16.msra.mxu1 %v969_v2  ;;  %s1087_s17 = scalar_lea.vmem %s1218_s2, %s842_s12 }
  0x10   : > { %v975_v4 = vld [vmem:[%s1050_s27] sm:$0xff]   ;;  %901 = vmatprep.subr.bf16.mxu0 %v970_v3  ;;  %946 = vmatprep.subr.bf16.mxu1 %v970_v3  ;;  %v976_v10 = vld [vmem:[%s1050_s27 + $0x8] sm:$0xff]   ;;  %v977_v12 = vld [vmem:[%s1050_s27 + $0x10] sm:$0xff]   ;;  %s843_s18 = sshll.u32 %s1224_s16, 3 }
  0x11   : > { %911 = vmatprep.mubr.bf16.mxu0 %v975_v4  ;;  %v983_v7 = vld [vmem:[%s1050_s27 + $0x40] sm:$0xff]   ;;  %v984_v11 = vld [vmem:[%s1050_s27 + $0x48] sm:$0xff]   ;;  %v985_v13 = vld [vmem:[%s1050_s27 + $0x50] sm:$0xff]   ;;  %s217_s21 = scalar_lea.vmem %s1219_s3, %s843_s18  ;;  %s221_s24 = scalar_lea.vmem %s1220_s4, %s843_s18 }
  0x12   : > { %927 = vmatprep.mubr.bf16.mxu1 %v983_v7  ;;  %v978_v14 = vld [vmem:[%s1050_s27 + $0x18] sm:$0xff]   ;;  %v979_v16 = vld [vmem:[%s1050_s27 + $0x20] sm:$0xff]   ;;  %v980_v18 = vld [vmem:[%s1050_s27 + $0x28] sm:$0xff]  }
  0x13   : > { %902 = vmatpush3.bf16.msra.mxu0 %v970_v3  ;;  %954 = vmatpush3.bf16.msra.mxu1 %v970_v3  ;;  %v986_v15 = vld [vmem:[%s1050_s27 + $0x58] sm:$0xff]   ;;  %v987_v17 = vld [vmem:[%s1050_s27 + $0x60] sm:$0xff]   ;;  %v988_v19 = vld [vmem:[%s1050_s27 + $0x68] sm:$0xff]  }
  0x14   : > { %903 = vmatprep.subr.bf16.mxu0 %v971_v5  ;;  %947 = vmatprep.subr.bf16.mxu1 %v971_v5  ;;  %v981_v20 = vld [vmem:[%s1050_s27 + $0x30] sm:$0xff]   ;;  %v982_v22 = vld [vmem:[%s1050_s27 + $0x38] sm:$0xff]  }
  0x15   : > { %v989_v21 = vld [vmem:[%s1050_s27 + $0x70] sm:$0xff]   ;;  %v990_v23 = vld [vmem:[%s1050_s27 + $0x78] sm:$0xff]  }
  0x17   : > { %904 = vmatpush3.bf16.msra.mxu0 %v971_v5  ;;  %955 = vmatpush3.bf16.msra.mxu1 %v971_v5 }
  0x18   : > { %905 = vmatprep.subr.bf16.mxu0 %v972_v6  ;;  %948 = vmatprep.subr.bf16.mxu1 %v972_v6 }
  0x1b   : > { %906 = vmatpush3.bf16.msra.mxu0 %v972_v6  ;;  %956 = vmatpush3.bf16.msra.mxu1 %v972_v6 }
  0x1c   : > { %907 = vmatprep.subr.bf16.mxu0 %v973_v8  ;;  %949 = vmatprep.subr.bf16.mxu1 %v973_v8 }
  0x1f   : > { %908 = vmatpush3.bf16.msra.mxu0 %v973_v8  ;;  %957 = vmatpush3.bf16.msra.mxu1 %v973_v8 }
  0x20   : > { %909 = vmatprep.subr.bf16.mxu0 %v974_v9  ;;  %950 = vmatprep.subr.bf16.mxu1 %v974_v9 }
  0x23   : > { %910 = vmatpush3.bf16.msra.mxu0 %v974_v9  ;;  %958 = vmatpush3.bf16.msra.mxu1 %v974_v9 }
  0x26   : > { %912 = vmatmul.mubr.bf16.vlgmr.msra.gmra.mrb[0].mxu0 %v976_v10  ;;  %928 = vmatmul.mubr.bf16.vlgmr.msra.gmra.mrb[0].mxu1 %v984_v11 }
  0x27   : > { %915 = vmatprep.mubr.bf16.mxu0 %v977_v12  ;;  %931 = vmatprep.mubr.bf16.mxu1 %v985_v13 }
  0x2e   : > { %916 = vmatmul.mubr.bf16.gmra.mrb[4].mxu0 %v978_v14  ;;  %932 = vmatmul.mubr.bf16.gmra.mrb[4].mxu1 %v986_v15 }
  0x2f   : > { %919 = vmatprep.mubr.bf16.mxu0 %v979_v16  ;;  %935 = vmatprep.mubr.bf16.mxu1 %v987_v17 }
  0x36   : > { %920 = vmatmul.mubr.bf16.gmra.mrb[8].mxu0 %v980_v18  ;;  %936 = vmatmul.mubr.bf16.gmra.mrb[8].mxu1 %v988_v19 }
  0x37   : > { %923 = vmatprep.mubr.bf16.mxu0 %v981_v20  ;;  %939 = vmatprep.mubr.bf16.mxu1 %v989_v21 }
  0x3e   : > { %924 = vmatmul.mubr.bf16.gmra.mrb[12].mxu0 %v982_v22  ;;  %940 = vmatmul.mubr.bf16.gmra.mrb[12].mxu1 %v990_v23 }
  0xf9   : > { %v913_v24 = vpop.f32.mrb[0].mxu0  ;;  %v1089_v25 = vpop.f32.mrb[0].mxu1 }
  0xfa   : > { %578 = vst [vmem:[%s1087_s17 + $0x10] sm:$0xff] %v913_v24  ;;  %v449_v26 = vpop.f32.mrb[1].mxu0  ;;  %594 = vst [vmem:[%s1087_s17 + $0x90] sm:$0xff] %v1089_v25  ;;  %v1094_v27 = vpop.f32.mrb[1].mxu1  ;;  %v647_v35 = vmul.f32 %v913_v24, %v913_v24 }
  0xfb   : > { %576 = vst [vmem:[%s1087_s17] sm:$0xff] %v449_v26  ;;  %v914_v28 = vpop.f32.mrb[2].mxu0  ;;  %592 = vst [vmem:[%s1087_s17 + $0x80] sm:$0xff] %v1094_v27  ;;  %v1099_v29 = vpop.f32.mrb[2].mxu1  ;;  %v645_v32 = vmul.f32 %v449_v26, %v449_v26 }
  0xfc   : > { %579 = vst [vmem:[%s1087_s17 + $0x18] sm:$0xff] %v914_v28  ;;  %v452_v30 = vpop.f32.mrb[3].mxu0  ;;  %595 = vst [vmem:[%s1087_s17 + $0x98] sm:$0xff] %v1099_v29  ;;  %v1104_v31 = vpop.f32.mrb[3].mxu1  ;;  %v648_v38 = vmul.f32 %v914_v28, %v914_v28 }
  0xfd   : > { %577 = vst [vmem:[%s1087_s17 + $0x8] sm:$0xff] %v452_v30  ;;  %v608_v33 = vadd.f32 %v452_v30, %v449_v26  ;;  %v646_v34 = vmul.f32 %v452_v30, %v452_v30  ;;  %593 = vst [vmem:[%s1087_s17 + $0x88] sm:$0xff] %v1104_v31 }
  0xff   : > { %v609_v36 = vadd.f32 %v913_v24, %v608_v33  ;;  %v677_v37 = vadd.f32 %v646_v34, %v645_v32 }
 0x101   : > { %v678_v39 = vadd.f32 %v677_v37, %v647_v35  ;;  %v917_v40 = vpop.f32.mrb[4].mxu0  ;;  %v610_v41 = vadd.f32 %v914_v28, %v609_v36  ;;  %v1109_v42 = vpop.f32.mrb[4].mxu1 }
 0x102   : > { %582 = vst [vmem:[%s1087_s17 + $0x30] sm:$0xff] %v917_v40  ;;  %v465_v43 = vpop.f32.mrb[5].mxu0  ;;  %598 = vst [vmem:[%s1087_s17 + $0xb0] sm:$0xff] %v1109_v42  ;;  %v1114_v44 = vpop.f32.mrb[5].mxu1  ;;  %v651_v55 = vmul.f32 %v917_v40, %v917_v40 }
 0x103   : > { %580 = vst [vmem:[%s1087_s17 + $0x20] sm:$0xff] %v465_v43  ;;  %v611_v45 = vadd.f32 %v610_v41, %v465_v43  ;;  %v649_v46 = vmul.f32 %v465_v43, %v465_v43  ;;  %v679_v47 = vadd.f32 %v678_v39, %v648_v38  ;;  %v918_v48 = vpop.f32.mrb[6].mxu0  ;;  %596 = vst [vmem:[%s1087_s17 + $0xa0] sm:$0xff] %v1114_v44  ;;  %v1119_v49 = vpop.f32.mrb[6].mxu1 }
 0x104   : > { %583 = vst [vmem:[%s1087_s17 + $0x38] sm:$0xff] %v918_v48  ;;  %v468_v50 = vpop.f32.mrb[7].mxu0  ;;  %599 = vst [vmem:[%s1087_s17 + $0xb8] sm:$0xff] %v1119_v49  ;;  %v1124_v51 = vpop.f32.mrb[7].mxu1  ;;  %v652_v58 = vmul.f32 %v918_v48, %v918_v48  ;;  %v661_v41 = vmul.f32 %v1094_v27, %v1094_v27 }
 0x105   : > { %v680_v52 = vadd.f32 %v679_v47, %v649_v46  ;;  %581 = vst [vmem:[%s1087_s17 + $0x28] sm:$0xff] %v468_v50  ;;  %v612_v53 = vadd.f32 %v611_v45, %v468_v50  ;;  %v650_v54 = vmul.f32 %v468_v50, %v468_v50  ;;  %597 = vst [vmem:[%s1087_s17 + $0xa8] sm:$0xff] %v1124_v51 }
 0x106   : > { %v663_v50 = vmul.f32 %v1089_v25, %v1089_v25 }
 0x107   : > { %v613_v56 = vadd.f32 %v917_v40, %v612_v53  ;;  %v681_v57 = vadd.f32 %v680_v52, %v650_v54  ;;  %v664_v54 = vmul.f32 %v1099_v29, %v1099_v29 }
 0x109   : > { %v682_v59 = vadd.f32 %v681_v57, %v651_v55  ;;  %v921_v60 = vpop.f32.mrb[8].mxu0  ;;  %v614_v61 = vadd.f32 %v918_v48, %v613_v56  ;;  %v1129_v62 = vpop.f32.mrb[8].mxu1  ;;  %v662_v48 = vmul.f32 %v1104_v31, %v1104_v31 }
 0x10a   : > { %586 = vst [vmem:[%s1087_s17 + $0x50] sm:$0xff] %v921_v60  ;;  %v481_v63 = vpop.f32.mrb[9].mxu0  ;;  %602 = vst [vmem:[%s1087_s17 + $0xd0] sm:$0xff] %v1129_v62  ;;  %v1134_v0 = vpop.f32.mrb[9].mxu1  ;;  %v655_v11 = vmul.f32 %v921_v60, %v921_v60 }
 0x10b   : > { %584 = vst [vmem:[%s1087_s17 + $0x40] sm:$0xff] %v481_v63  ;;  %v615_v1 = vadd.f32 %v614_v61, %v481_v63  ;;  %v653_v2 = vmul.f32 %v481_v63, %v481_v63  ;;  %v683_v3 = vadd.f32 %v682_v59, %v652_v58  ;;  %v922_v4 = vpop.f32.mrb[10].mxu0  ;;  %600 = vst [vmem:[%s1087_s17 + $0xc0] sm:$0xff] %v1134_v0  ;;  %v1139_v5 = vpop.f32.mrb[10].mxu1 }
 0x10c   : > { %587 = vst [vmem:[%s1087_s17 + $0x58] sm:$0xff] %v922_v4  ;;  %v484_v6 = vpop.f32.mrb[11].mxu0  ;;  %603 = vst [vmem:[%s1087_s17 + $0xd8] sm:$0xff] %v1139_v5  ;;  %v1144_v7 = vpop.f32.mrb[11].mxu1  ;;  %v656_v14 = vmul.f32 %v922_v4, %v922_v4 }
 0x10d   : > { %v684_v8 = vadd.f32 %v683_v3, %v653_v2  ;;  %585 = vst [vmem:[%s1087_s17 + $0x48] sm:$0xff] %v484_v6  ;;  %v616_v9 = vadd.f32 %v615_v1, %v484_v6  ;;  %v654_v10 = vmul.f32 %v484_v6, %v484_v6  ;;  %601 = vst [vmem:[%s1087_s17 + $0xc8] sm:$0xff] %v1144_v7 }
 0x10f   : > { %v617_v12 = vadd.f32 %v921_v60, %v616_v9  ;;  %v685_v13 = vadd.f32 %v684_v8, %v654_v10  ;;  %v666_v60 = vmul.f32 %v1124_v51, %v1124_v51  ;;  %v670_v8 = vmul.f32 %v1144_v7, %v1144_v7 }
 0x111   : > { %v686_v15 = vadd.f32 %v685_v13, %v655_v11  ;;  %v925_v16 = vpop.f32.mrb[12].mxu0  ;;  %v618_v17 = vadd.f32 %v922_v4, %v617_v12  ;;  %v1149_v18 = vpop.f32.mrb[12].mxu1 }
 0x112   : > { %590 = vst [vmem:[%s1087_s17 + $0x70] sm:$0xff] %v925_v16  ;;  %v497_v19 = vpop.f32.mrb[13].mxu0  ;;  %606 = vst [vmem:[%s1087_s17 + $0xf0] sm:$0xff] %v1149_v18  ;;  %v561_v20 = vpop.f32.mrb[13].mxu1  ;;  %v659_v35 = vmul.f32 %v925_v16, %v925_v16 }
 0x113   : > { %588 = vst [vmem:[%s1087_s17 + $0x60] sm:$0xff] %v497_v19  ;;  %v619_v21 = vadd.f32 %v618_v17, %v497_v19  ;;  %v657_v22 = vmul.f32 %v497_v19, %v497_v19  ;;  %v687_v23 = vadd.f32 %v686_v15, %v656_v14  ;;  %v926_v24 = vpop.f32.mrb[14].mxu0  ;;  %604 = vst [vmem:[%s1087_s17 + $0xe0] sm:$0xff] %v561_v20  ;;  %v1156_v26 = vpop.f32.mrb[14].mxu1 }
 0x114   : > { %591 = vst [vmem:[%s1087_s17 + $0x78] sm:$0xff] %v926_v24  ;;  %v500_v28 = vpop.f32.mrb[15].mxu0  ;;  %607 = vst [vmem:[%s1087_s17 + $0xf8] sm:$0xff] %v1156_v26  ;;  %v564_v30 = vpop.f32.mrb[15].mxu1  ;;  %v660_v38 = vmul.f32 %v926_v24, %v926_v24  ;;  %v673_v12 = vmul.f32 %v561_v20, %v561_v20  ;;  %v675_v17 = vmul.f32 %v1149_v18, %v1149_v18 }
 0x115   : > { %v688_v32 = vadd.f32 %v687_v23, %v657_v22  ;;  %589 = vst [vmem:[%s1087_s17 + $0x68] sm:$0xff] %v500_v28  ;;  %v620_v33 = vadd.f32 %v619_v21, %v500_v28  ;;  %v658_v34 = vmul.f32 %v500_v28, %v500_v28  ;;  %605 = vst [vmem:[%s1087_s17 + $0xe8] sm:$0xff] %v564_v30 }
 0x116   : > { %v676_v21 = vmul.f32 %v1156_v26, %v1156_v26 }
 0x117   : > { %v621_v36 = vadd.f32 %v925_v16, %v620_v33  ;;  %v689_v37 = vadd.f32 %v688_v32, %v658_v34 }
 0x119   : > { %v690_v39 = vadd.f32 %v689_v37, %v659_v35  ;;  %v622_v40 = vadd.f32 %v926_v24, %v621_v36 }
 0x11b   : > { %v623_v43 = vadd.f32 %v622_v40, %v1094_v27  ;;  %v691_v45 = vadd.f32 %v690_v39, %v660_v38  ;;  %v665_v27 = vmul.f32 %v1114_v44, %v1114_v44 }
 0x11d   : > { %v692_v46 = vadd.f32 %v691_v45, %v661_v41  ;;  %v624_v47 = vadd.f32 %v623_v43, %v1104_v31 }
 0x11f   : > { %v625_v52 = vadd.f32 %v1089_v25, %v624_v47  ;;  %v693_v53 = vadd.f32 %v692_v46, %v662_v48  ;;  %v667_v25 = vmul.f32 %v1109_v42, %v1109_v42 }
 0x121   : > { %v694_v55 = vadd.f32 %v693_v53, %v663_v50  ;;  %v626_v56 = vadd.f32 %v1099_v29, %v625_v52  ;;  %v668_v29 = vmul.f32 %v1119_v49, %v1119_v49 }
 0x123   : > { %v627_v57 = vadd.f32 %v626_v56, %v1114_v44  ;;  %v695_v58 = vadd.f32 %v694_v55, %v664_v54  ;;  %v669_v44 = vmul.f32 %v1134_v0, %v1134_v0 }
 0x125   : > { %v696_v59 = vadd.f32 %v695_v58, %v665_v27  ;;  %v628_v31 = vadd.f32 %v627_v57, %v1124_v51 }
 0x127   : > { %v629_v61 = vadd.f32 %v1109_v42, %v628_v31  ;;  %v697_v63 = vadd.f32 %v696_v59, %v666_v60  ;;  %v671_v42 = vmul.f32 %v1129_v62, %v1129_v62 }
 0x129   : > { %v698_v1 = vadd.f32 %v697_v63, %v667_v25  ;;  %v630_v2 = vadd.f32 %v1119_v49, %v629_v61  ;;  %v672_v49 = vmul.f32 %v1139_v5, %v1139_v5 }
 0x12b   : > { %v631_v3 = vadd.f32 %v630_v2, %v1134_v0  ;;  %v699_v4 = vadd.f32 %v698_v1, %v668_v29 }
 0x12d   : > { %v700_v6 = vadd.f32 %v699_v4, %v669_v44  ;;  %v632_v51 = vadd.f32 %v631_v3, %v1144_v7  ;;  %v674_v7 = vmul.f32 %v564_v30, %v564_v30 }
 0x12f   : > { %v633_v9 = vadd.f32 %v1129_v62, %v632_v51  ;;  %v701_v10 = vadd.f32 %v700_v6, %v670_v8 }
 0x131   : > { %v702_v11 = vadd.f32 %v701_v10, %v671_v42  ;;  %v634_v0 = vadd.f32 %v1139_v5, %v633_v9 }
 0x133   : > { %v635_v13 = vadd.f32 %v634_v0, %v561_v20  ;;  %v703_v14 = vadd.f32 %v702_v11, %v672_v49 }
 0x135   : > { %v704_v15 = vadd.f32 %v703_v14, %v673_v12  ;;  %v636_v16 = vadd.f32 %v635_v13, %v564_v30 }
 0x137   : > { %v637_v19 = vadd.f32 %v1149_v18, %v636_v16  ;;  %v705_v62 = vadd.f32 %v704_v15, %v674_v7 }
 0x139   : > { %v638_v22 = vadd.f32 %v1156_v26, %v637_v19  ;;  %v706_v5 = vadd.f32 %v705_v62, %v675_v17 }
 0x13b   : > { %v639_v23 = vrot.slane %v638_v22, 4  ;;  %v707_v24 = vadd.f32 %v706_v5, %v676_v21 }
 0x13d   : > { %v640_v20 = vadd.f32 %v639_v23, %v638_v22  ;;  %v708_v28 = vrot.slane %v707_v24, 4 }
 0x13f   : > { %v641_v32 = vrot.slane %v640_v20, 2  ;;  %v709_v30 = vadd.f32 %v708_v28, %v707_v24 }
 0x141   : > { %v642_v33 = vadd.f32 %v641_v32, %v640_v20  ;;  %v710_v34 = vrot.slane %v709_v30, 2 }
 0x143   : > { %v643_v35 = vrot.slane %v642_v33, 1  ;;  %v711_v18 = vadd.f32 %v710_v34, %v709_v30 }
 0x145   : > { %v644_v36 = vadd.f32 %v643_v35, %v642_v33  ;;  %v712_v37 = vrot.slane %v711_v18, 1 }
 0x147   : > { %v713_v26 = vadd.f32 %v712_v37, %v711_v18  ;;  %714 = vst [vmem:[%s217_s21] sm:$0xff] %v644_v36 }
 0x149   : > { %715 = vst [vmem:[%s221_s24] sm:$0xff] %v713_v26 }
 0x14a PF: > { %s15_s15 = sadd.s32 1, %s997_s15  }
 0x14b   : > { %p12_p5 = scmp.ge.s32.totalorder %s15_s15, 4  }
 0x14d   :  { %14 = sbr.rel (!%p12_p5) target bundleno = 1 (0x1), region = 82 }

</bundles_post_ra>
